<compile_context>
chip_gen: v7x
topology: tpu7x:2x2x1
jax: 0.10.0
libtpu: 0.0.40
codegen_flags: <defaults>
</compile_context>

<pallas_src>
import functools

import jax
import jax.numpy as jnp
from jax.experimental import pallas as pl
from jax.experimental.pallas import tpu as pltpu

_LANE = 128


def _default_vmem_limit():
    # 48 MiB is fine on v5e/v6e (128 MiB VMEM); cap at half the physical VMEM
    # so v7x (64 MiB per TensorCore) keeps headroom for double buffering.
    limit = 48 * 1024 * 1024
    try:
        cap = int(pltpu.get_tpu_info().vmem_capacity_bytes)
        limit = min(limit, cap // 2)
    except Exception:
        pass
    return limit


_VMEM_LIMIT = _default_vmem_limit()


# ------------------------------ small helpers -------------------------------

def _round_up(n, m):
    return ((n + m - 1) // m) * m


def _choose_tile(dim, prefs=(512, 256, 128)):
    for t in prefs:
        if dim % t == 0 and dim >= t:
            return t
    return dim


def _choose_tm(m_padded):
    # Prefer large row tiles, but keep the parallel grid axis >= 2 when we can
    # (v7x has 2 TensorCores per chip).
    for t in (512, 256, 128):
        if m_padded % t == 0 and m_padded // t >= 2:
            return t
    return min(m_padded, 128)


def _choose_row_tile(h_out, w_out):
    """conv2 output-row tile: th divides h_out, th*w_out is a legal
    (multiple-of-8) sublane block; prefer <=256 rows/tile and >=2 tiles."""
    candidates = [t for t in range(1, h_out + 1)
                  if h_out % t == 0 and (t * w_out) % 8 == 0]
    if not candidates:
        return h_out                      # full-image block (block == full dim)
    good = [t for t in candidates if t * w_out <= 256 and h_out // t >= 2]
    if good:
        return max(good)
    small = [t for t in candidates if t * w_out <= 256]
    if small:
        return max(small)
    return min(candidates)


def _pad_rows(x2d, mult=_LANE):
    m = x2d.shape[0]
    mp = _round_up(m, mult)
    if mp != m:
        x2d = jnp.pad(x2d, ((0, mp - m), (0, 0)))
    return x2d


# ----------------------------- Pallas kernels --------------------------------

def _mm_bn_kernel(x_ref, w_ref, s_ref, b_ref, o_ref, *scratch, relu, k_steps):
    """(M,N,K)-tiled: out = act((x @ w) * scale + bias).  On the last K step
    the epilogue is computed from the fresh partial (no acc store+reload)."""
    part = jnp.dot(x_ref[...], w_ref[...], preferred_element_type=jnp.float32)

    if k_steps == 1:
        y = part * s_ref[...] + b_ref[...]
        if relu:
            y = jnp.maximum(y, 0.0)
        o_ref[...] = y.astype(o_ref.dtype)
        return

    acc_ref = scratch[0]
    k = pl.program_id(2)

    @pl.when(k == 0)
    def _():
        acc_ref[...] = part

    @pl.when(jnp.logical_and(k > 0, k < k_steps - 1))
    def _():
        acc_ref[...] += part

    @pl.when(k == k_steps - 1)
    def _():
        y = (acc_ref[...] + part) * s_ref[...] + b_ref[...]
        if relu:
            y = jnp.maximum(y, 0.0)
        o_ref[...] = y.astype(o_ref.dtype)


def matmul_bn_act(x2d, w, scale, bias, *, relu=True, out_dtype=jnp.bfloat16):
    """Fused 1x1-conv-as-matmul + folded BN (+ ReLU), bf16 MXU, tiled M/N/K."""
    m, k = x2d.shape
    cout = w.shape[1]
    tm = _choose_tm(m)
    tk = _choose_tile(k)
    tn = _choose_tile(cout)
    k_steps = k // tk
    grid = (m // tm, cout // tn, k_steps)
    scratch = [] if k_steps == 1 else [pltpu.VMEM((tm, tn), jnp.float32)]
    return pl.pallas_call(
        functools.partial(_mm_bn_kernel, relu=relu, k_steps=k_steps),
        grid=grid,
        in_specs=[
            pl.BlockSpec((tm, tk), lambda i, j, kk: (i, kk)),
            pl.BlockSpec((tk, tn), lambda i, j, kk: (kk, j)),
            pl.BlockSpec((1, tn), lambda i, j, kk: (0, j)),
            pl.BlockSpec((1, tn), lambda i, j, kk: (0, j)),
        ],
        out_specs=pl.BlockSpec((tm, tn), lambda i, j, kk: (i, j)),
        out_shape=jax.ShapeDtypeStruct((m, cout), out_dtype),
        scratch_shapes=scratch,
        compiler_params=pltpu.CompilerParams(
            dimension_semantics=("parallel", "parallel", "arbitrary"),
            vmem_limit_bytes=_VMEM_LIMIT),
    )(x2d, w, scale, bias)


def _conv3x3_bn_relu_kernel(x_ref, w_ref, s_ref, b_ref, o_ref, *,
                            stride, th, w_out):
    """3x3 conv for one output-row tile.  The kw taps are folded into the
    contraction dim: 3 MXU dots with K = 3*cin (fills the 256-deep MXU on
    v6e/v7x), followed by folded-BN + ReLU.  The per-batch padded/phase image
    is resident in VMEM; rows are selected with dynamic slices."""
    r = pl.program_id(1)
    row0 = r * th                                   # output-row tile start
    cin = x_ref.shape[-1]
    cout = o_ref.shape[-1]
    acc = jnp.zeros((th * w_out, cout), jnp.float32)
    for kh in range(3):
        r0 = kh // stride
        rows_by_phase = {}
        taps = []
        for kw in range(3):
            ph = (kh % stride) * stride + (kw % stride)   # phase plane
            c0 = kw // stride                             # static col offset
            if ph not in rows_by_phase:
                rows_by_phase[ph] = x_ref[0, ph, pl.ds(row0 + r0, th), :, :]
            tap = rows_by_phase[ph][:, c0:c0 + w_out, :]  # (th, w_out, cin)
            taps.append(tap.reshape(th * w_out, cin))
        slab = jnp.concatenate(taps, axis=-1)             # (th*w_out, 3*cin) bf16
        acc += jnp.dot(slab, w_ref[kh], preferred_element_type=jnp.float32)
    y = jnp.maximum(acc * s_ref[...] + b_ref[...], 0.0)
    o_ref[...] = y.reshape(o_ref.shape).astype(o_ref.dtype)


def conv3x3_bn_relu(x_phases, w, scale, bias, *, stride, h_out, w_out,
                    out_dtype=jnp.bfloat16):
    n, nph, rows, cols, cin = x_phases.shape
    cout = w.shape[-1]
    assert w.shape[1] == 3 * cin
    th = _choose_row_tile(h_out, w_out)
    n_row_tiles = h_out // th
    out3d = pl.pallas_call(
        functools.partial(_conv3x3_bn_relu_kernel, stride=stride, th=th,
                          w_out=w_out),
        grid=(n, n_row_tiles),
        in_specs=[
            # Whole per-batch image; block index constant across row tiles ->
            # DMA'd once per image, resident across the inner grid axis.
            pl.BlockSpec((1, nph, rows, cols, cin),
                         lambda i, r: (i, 0, 0, 0, 0)),
            pl.BlockSpec((3, 3 * cin, cout), lambda i, r: (0, 0, 0)),
            pl.BlockSpec((1, cout), lambda i, r: (0, 0)),
            pl.BlockSpec((1, cout), lambda i, r: (0, 0)),
        ],
        out_specs=pl.BlockSpec((1, th * w_out, cout), lambda i, r: (i, r, 0)),
        out_shape=jax.ShapeDtypeStruct((n, h_out * w_out, cout), out_dtype),
        compiler_params=pltpu.CompilerParams(
            dimension_semantics=("parallel", "parallel"),
            vmem_limit_bytes=_VMEM_LIMIT),
    )(x_phases, w, scale, bias)
    # (n, h_out*w_out, cout) -> (n*h_out*w_out, cout): layout-compatible, free.
    return out3d.reshape(n * h_out * w_out, cout)


def _conv3_proj_kernel(y_ref, w3_ref, s3_ref, b3_ref,
                       xs_ref, ws_ref, ss_ref, bs_ref, o_ref):
    """out = relu((y@w3)*s3+b3 + (xs@ws)*ss+bs) -- conv3 + projection shortcut."""
    main = jnp.dot(y_ref[...], w3_ref[...], preferred_element_type=jnp.float32)
    main = main * s3_ref[...] + b3_ref[...]
    sc = jnp.dot(xs_ref[...], ws_ref[...], preferred_element_type=jnp.float32)
    sc = sc * ss_ref[...] + bs_ref[...]
    o_ref[...] = jnp.maximum(main + sc, 0.0).astype(o_ref.dtype)


def _conv3_id_kernel(y_ref, w3_ref, s3_ref, b3_ref, r_ref, o_ref):
    """out = relu((y@w3)*s3+b3 + residual) -- conv3 + identity shortcut (f32 residual)."""
    main = jnp.dot(y_ref[...], w3_ref[...], preferred_element_type=jnp.float32)
    main = main * s3_ref[...] + b3_ref[...] + r_ref[...].astype(jnp.float32)
    o_ref[...] = jnp.maximum(main, 0.0).astype(o_ref.dtype)


def conv3_shortcut_fused(y2d, w3, s3, b3, *, xs2d=None, ws=None, ss=None,
                         bs=None, residual=None):
    m, kp = y2d.shape
    ep = w3.shape[1]
    tm = _choose_tm(m)
    grid = (m // tm,)

    def row_spec(cols):
        return pl.BlockSpec((tm, cols), lambda i: (i, 0))

    def full_spec(r, c):
        return pl.BlockSpec((r, c), lambda i: (0, 0))

    vec_spec = pl.BlockSpec((1, ep), lambda i: (0, 0))
    out_spec = pl.BlockSpec((tm, ep), lambda i: (i, 0))
    cparams = pltpu.CompilerParams(dimension_semantics=("parallel",),
                                   vmem_limit_bytes=_VMEM_LIMIT)
    out_shape = jax.ShapeDtypeStruct((m, ep), jnp.float32)

    if xs2d is not None:
        cp = xs2d.shape[1]
        return pl.pallas_call(
            _conv3_proj_kernel,
            grid=grid,
            in_specs=[row_spec(kp), full_spec(kp, ep), vec_spec, vec_spec,
                      row_spec(cp), full_spec(cp, ep), vec_spec, vec_spec],
            out_specs=out_spec,
            out_shape=out_shape,
            compiler_params=cparams,
        )(y2d, w3, s3, b3, xs2d, ws, ss, bs)

    return pl.pallas_call(
        _conv3_id_kernel,
        grid=grid,
        in_specs=[row_spec(kp), full_spec(kp, ep), vec_spec, vec_spec,
                  row_spec(ep)],
        out_specs=out_spec,
        out_shape=out_shape,
        compiler_params=cparams,
    )(y2d, w3, s3, b3, residual)


# ------------------------------- JAX glue ------------------------------------

def _bn_fold(gamma, beta, mean, var, eps=1e-5):
    scale = gamma / jnp.sqrt(var + eps)
    bias = beta - mean * scale
    return scale, bias


def _pad_vec(v, target):
    return jnp.pad(v, (0, target - v.shape[0])).reshape(1, target).astype(jnp.float32)


def prepare_bottleneck_params(params, in_planes):
    """One-time (hoisted) prep: fold BN, transpose to (K, Cout), zero-pad all
    channel dims to lane-dense multiples of 128, fold conv2's kw taps into the
    contraction dim, cast weights to bf16."""
    planes = params["conv1"].shape[0]
    exp = params["conv3"].shape[0]
    cin_p = _round_up(in_planes, _LANE)
    planes_p = _round_up(planes, _LANE)
    exp_p = _round_up(exp, _LANE)

    def prep_1x1(w_oihw, cin, cout, cin_pad, cout_pad):
        w = w_oihw[:, :, 0, 0].T                               # (cin, cout)
        return jnp.pad(w, ((0, cin_pad - cin),
                           (0, cout_pad - cout))).astype(jnp.bfloat16)

    s1, b1 = _bn_fold(*params["bn1"])
    s2, b2 = _bn_fold(*params["bn2"])
    s3, b3 = _bn_fold(*params["bn3"])

    w2 = jnp.transpose(params["conv2"], (2, 3, 1, 0))          # (3,3,cin,cout)
    w2 = jnp.pad(w2, ((0, 0), (0, 0), (0, planes_p - planes),
                      (0, planes_p - planes)))
    # Fold kw into K: (3, 3*cin_p, cout_p) with K index = kw*cin_p + ci.
    w2 = w2.reshape(3, 3 * planes_p, planes_p).astype(jnp.bfloat16)

    prep = {
        "w1": prep_1x1(params["conv1"], in_planes, planes, cin_p, planes_p),
        "s1": _pad_vec(s1, planes_p), "b1": _pad_vec(b1, planes_p),
        "w2": w2, "s2": _pad_vec(s2, planes_p), "b2": _pad_vec(b2, planes_p),
        "w3": prep_1x1(params["conv3"], planes, exp, planes_p, exp_p),
        "s3": _pad_vec(s3, exp_p), "b3": _pad_vec(b3, exp_p),
        "cin_p": cin_p, "planes_p": planes_p, "exp": exp, "exp_p": exp_p,
        "has_proj": "conv_sc" in params,
    }
    if prep["has_proj"]:
        ss, bs = _bn_fold(*params["bn_sc"])
        prep["ws"] = prep_1x1(params["conv_sc"], in_planes, exp, cin_p, exp_p)
        prep["ss"] = _pad_vec(ss, exp_p)
        prep["bs"] = _pad_vec(bs, exp_p)
    return prep


def _phase_split(x_pad, stride, h_out, w_out):
    """stride==2 only: rearrange the spatially padded NHWC tensor so that every
    3x3 tap becomes a contiguous window of its phase plane.
    Output: (N, 4, h_out+1, w_out+1, C)."""
    assert stride == 2
    rows, cols = h_out + 1, w_out + 1     # r0, c0 in {0,1} plus h_out/w_out - 1
    phases = []
    for ph in range(stride):
        for pw in range(stride):
            sub = x_pad[:, ph::stride, pw::stride, :][:, :rows, :cols, :]
            pad_r = rows - sub.shape[1]
            pad_c = cols - sub.shape[2]
            if pad_r or pad_c:
                sub = jnp.pad(sub, ((0, 0), (0, pad_r), (0, pad_c), (0, 0)))
            phases.append(sub)
    return jnp.stack(phases, axis=1)


def bottleneck_forward(x, prep, stride=1):
    """Mirrors Bottleneck.forward: accepts x or (x, output_list), returns tuple."""
    if isinstance(x, tuple):
        x_nchw, output_list = x
        output_list = list(output_list)
    else:
        x_nchw, output_list = x, []

    assert stride in (1, 2), "ResNet Bottleneck only uses stride 1 or 2"
    n, c, h, w = x_nchw.shape
    cin_p, planes_p = prep["cin_p"], prep["planes_p"]
    exp, exp_p = prep["exp"], prep["exp_p"]
    h_out = (h - 1) // stride + 1
    w_out = (w - 1) // stride + 1

    # NHWC, channel-padded (lane-dense).
    x_nhwc = jnp.transpose(x_nchw, (0, 2, 3, 1))
    x_nhwc = jnp.pad(x_nhwc, ((0, 0), (0, 0), (0, 0), (0, cin_p - c)))
    x_bf16 = x_nhwc.astype(jnp.bfloat16)

    # conv1 (1x1) + bn1 + relu -- fused (M,N,K)-tiled bf16 matmul; bf16 output
    # halves the HBM traffic of the largest intermediate.
    m1 = n * h * w
    out1 = matmul_bn_act(_pad_rows(x_bf16.reshape(m1, cin_p)),
                         prep["w1"], prep["s1"], prep["b1"],
                         relu=True, out_dtype=jnp.bfloat16)
    out1 = out1[:m1].reshape(n, h, w, planes_p)

    # conv2 (3x3, stride, pad=1) + bn2 + relu -- row-tiled, kw folded into K.
    out1_pad = jnp.pad(out1, ((0, 0), (1, 1), (1, 1), (0, 0)))
    if stride == 1:
        x_phases = out1_pad[:, None]          # free reshape, no phase stack
    else:
        x_phases = _phase_split(out1_pad, stride, h_out, w_out)
    out2 = conv3x3_bn_relu(x_phases, prep["w2"], prep["s2"], prep["b2"],
                           stride=stride, h_out=h_out, w_out=w_out,
                           out_dtype=jnp.bfloat16)

    # conv3 (1x1) + bn3 + shortcut (1x1 conv + BN, or identity) + add + relu,
    # fused in one kernel: the shortcut never round-trips through HBM.
    m2 = n * h_out * w_out
    y2d = _pad_rows(out2)                     # (m2, planes_p) bf16, usually no-op
    if prep["has_proj"]:
        xs = x_bf16[:, ::stride, ::stride, :].reshape(m2, cin_p)
        out = conv3_shortcut_fused(y2d, prep["w3"], prep["s3"], prep["b3"],
                                   xs2d=_pad_rows(xs), ws=prep["ws"],
                                   ss=prep["ss"], bs=prep["bs"])
    else:
        # Identity shortcut: keep the residual in f32 (PyTorch adds the un-cast
        # input); here cin_p == exp_p.
        res = _pad_rows(x_nhwc.reshape(m2, cin_p))
        out = conv3_shortcut_fused(y2d, prep["w3"], prep["s3"], prep["b3"],
                                   residual=res)

    out = out[:m2].reshape(n, h_out, w_out, exp_p)[..., :exp]
    out = jnp.transpose(out, (0, 3, 1, 2))            # back to NCHW
    output_list.append(out)
    return (out, output_list)


# ------------------------- synthetic params & reference ----------------------

def init_bottleneck_params(key, in_planes, planes, stride=1):
    """Deterministic synthetic parameters (PyTorch weight layouts: OIHW)."""
    exp = 4
    ks = jax.random.split(key, 8)

    def conv_w(k, cout, cin, kh, kw):
        return 0.1 * jax.random.normal(k, (cout, cin, kh, kw), jnp.float32)

    def bn(k, c):
        k1, k2, k3 = jax.random.split(k, 3)
        gamma = 1.0 + 0.1 * jax.random.normal(k1, (c,), jnp.float32)
        beta = 0.1 * jax.random.normal(k2, (c,), jnp.float32)
        mean = 0.1 * jax.random.normal(k3, (c,), jnp.float32)
        var = jnp.ones((c,), jnp.float32)
        return (gamma, beta, mean, var)

    params = {
        "conv1": conv_w(ks[0], planes, in_planes, 1, 1),
        "bn1": bn(ks[1], planes),
        "conv2": conv_w(ks[2], planes, planes, 3, 3),
        "bn2": bn(ks[3], planes),
        "conv3": conv_w(ks[4], exp * planes, planes, 1, 1),
        "bn3": bn(ks[5], exp * planes),
    }
    if stride != 1 or in_planes != exp * planes:
        params["conv_sc"] = conv_w(ks[6], exp * planes, in_planes, 1, 1)
        params["bn_sc"] = bn(ks[7], exp * planes)
    return params


def _bn_ref(y, gamma, beta, mean, var, eps=1e-5):
    g = gamma.reshape(1, -1, 1, 1)
    b = beta.reshape(1, -1, 1, 1)
    m = mean.reshape(1, -1, 1, 1)
    v = var.reshape(1, -1, 1, 1)
    return (y - m) / jnp.sqrt(v + eps) * g + b


def reference_forward(x, params, stride):
    def conv(x, w, s, p):
        return jax.lax.conv_general_dilated(
            x, w, window_strides=(s, s), padding=[(p, p), (p, p)],
            dimension_numbers=("NCHW", "OIHW", "NCHW"))
    out = jax.nn.relu(_bn_ref(conv(x, params["conv1"], 1, 0), *params["bn1"]))
    out = jax.nn.relu(_bn_ref(conv(out, params["conv2"], stride, 1), *params["bn2"]))
    out = _bn_ref(conv(out, params["conv3"], 1, 0), *params["bn3"])
    if "conv_sc" in params:
        sc = _bn_ref(conv(x, params["conv_sc"], stride, 0), *params["bn_sc"])
    else:
        sc = x
    return jax.nn.relu(out + sc)


# ---------------------------------- main --------------------------------------

if __name__ == "__main__":
    key = jax.random.PRNGKey(0)
    kx, kp = jax.random.split(key)

    N, H, W = 2, 16, 16

    cases = [
        dict(in_planes=4, planes=4, stride=1),    # projection shortcut
        dict(in_planes=4, planes=4, stride=2),    # projection shortcut, stride 2
        dict(in_planes=16, planes=4, stride=1),   # identity shortcut
    ]

    for cfg in cases:
        C, planes, stride = cfg["in_planes"], cfg["planes"], cfg["stride"]
        x = jax.random.normal(kx, (N, C, H, W), jnp.float32)

        params = init_bottleneck_params(kp, C, planes, stride)
        prep = prepare_bottleneck_params(params, C)

        out, output_list = bottleneck_forward(x, prep, stride)
        out = jax.block_until_ready(out)
        ref = jax.block_until_ready(reference_forward(x, params, stride))

        h_out = (H - 1) // stride + 1
        assert out.shape == (N, 4 * planes, h_out, h_out), out.shape
        assert len(output_list) == 1
        err = float(jnp.max(jnp.abs(out - ref)))
        assert jnp.allclose(out, ref, atol=3e-2, rtol=3e-2), (
            f"{cfg}: mismatch vs reference (max abs err {err:.4f})")

    print("KERNEL_OK")
</pallas_src>

<mosaic_0001>
module attributes {stable_mosaic.version = 11 : i64} {
  func.func @_mm_bn_kernel(%arg0: i32, %arg1: i32, %arg2: i32, %arg3: memref<256x128xbf16, #tpu.memory_space<vmem>>, %arg4: memref<128x128xbf16, #tpu.memory_space<vmem>>, %arg5: memref<1x128xf32, #tpu.memory_space<vmem>>, %arg6: memref<1x128xf32, #tpu.memory_space<vmem>>, %arg7: memref<256x128xbf16, #tpu.memory_space<vmem>>) attributes {dimension_semantics = [#tpu.dimension_semantics<parallel>, #tpu.dimension_semantics<parallel>, #tpu.dimension_semantics<arbitrary>], iteration_bounds = array<i64: 2, 1, 1>, scalar_prefetch = 0 : i64, scratch_operands = 0 : i64, tpu.core_type = #tpu.core_type<tc>, window_params = [{transform_indices = @transform_0, window_bounds = array<i64: 256, 128>}, {transform_indices = @transform_1, window_bounds = array<i64: 128, 128>}, {transform_indices = @transform_2, window_bounds = array<i64: 1, 128>}, {transform_indices = @transform_3, window_bounds = array<i64: 1, 128>}, {transform_indices = @transform_4, window_bounds = array<i64: 256, 128>}]} {
    %c0 = arith.constant 0 : index
    %c0_0 = arith.constant 0 : index
    %0 = vector.load %arg3[%c0, %c0_0] : memref<256x128xbf16, #tpu.memory_space<vmem>>, vector<256x128xbf16>
    %c0_1 = arith.constant 0 : index
    %c0_2 = arith.constant 0 : index
    %1 = vector.load %arg4[%c0_1, %c0_2] : memref<128x128xbf16, #tpu.memory_space<vmem>>, vector<128x128xbf16>
    %cst = arith.constant dense<0.000000e+00> : vector<256x128xf32>
    %2 = tpu.matmul %0, %1, %cst {dimension_numbers = #tpu.dot_dimension_numbers<[1], [0], [0], [1], [0, 0, 1, 1], [], []>} : vector<256x128xbf16>, vector<128x128xbf16>, vector<256x128xf32> -> vector<256x128xf32>
    %c0_3 = arith.constant 0 : index
    %c0_4 = arith.constant 0 : index
    %3 = vector.load %arg5[%c0_3, %c0_4] : memref<1x128xf32, #tpu.memory_space<vmem>>, vector<1x128xf32>
    %4 = vector.broadcast %3 : vector<1x128xf32> to vector<256x128xf32>
    %5 = arith.mulf %2, %4 : vector<256x128xf32>
    %c0_5 = arith.constant 0 : index
    %c0_6 = arith.constant 0 : index
    %6 = vector.load %arg6[%c0_5, %c0_6] : memref<1x128xf32, #tpu.memory_space<vmem>>, vector<1x128xf32>
    %7 = vector.broadcast %6 : vector<1x128xf32> to vector<256x128xf32>
    %8 = arith.addf %5, %7 : vector<256x128xf32>
    %cst_7 = arith.constant 0.000000e+00 : f32
    %9 = vector.broadcast %cst_7 : f32 to vector<256x128xf32>
    %10 = arith.maximumf %8, %9 : vector<256x128xf32>
    %11 = arith.truncf %10 : vector<256x128xf32> to vector<256x128xbf16>
    %c0_8 = arith.constant 0 : index
    %c0_9 = arith.constant 0 : index
    %12 = vector.load %arg7[%c0_8, %c0_9] : memref<256x128xbf16, #tpu.memory_space<vmem>>, vector<256x128xbf16>
    tpu.vector_store %arg7[%c0_8, %c0_9], %11 {strides = array<i32>} : memref<256x128xbf16, #tpu.memory_space<vmem>>, vector<256x128xbf16>,
    return
  }
  func.func @transform_0(%arg0: i32, %arg1: i32, %arg2: i32) -> (i32, i32) {
    %c0_i32 = arith.constant 0 : i32
    return %arg0, %arg2 : i32, i32
  }
  func.func @transform_1(%arg0: i32, %arg1: i32, %arg2: i32) -> (i32, i32) {
    %c0_i32 = arith.constant 0 : i32
    return %arg2, %arg1 : i32, i32
  }
  func.func @transform_2(%arg0: i32, %arg1: i32, %arg2: i32) -> (i32, i32) {
    %c0_i32 = arith.constant 0 : i32
    %c0_i32_0 = arith.constant 0 : i32
    return %c0_i32, %arg1 : i32, i32
  }
  func.func @transform_3(%arg0: i32, %arg1: i32, %arg2: i32) -> (i32, i32) {
    %c0_i32 = arith.constant 0 : i32
    %c0_i32_0 = arith.constant 0 : i32
    return %c0_i32, %arg1 : i32, i32
  }
  func.func @transform_4(%arg0: i32, %arg1: i32, %arg2: i32) -> (i32, i32) {
    %c0_i32 = arith.constant 0 : i32
    return %arg0, %arg1 : i32, i32
  }
}

</mosaic_0001>

<bundles_post_ra>
// kernel: tpu_custom_call.1
= control target key start
LH: loop header
LB: loop body
LE: loop exit
PB: predicated region body
PF: predicated region fallthrough
CT: control target
= control target key end

     0   :  { %9 = vsyncpa [#allocation3], 0  ;;  %s1975_s0 = inlined_call_operand.hbm [shape: bf16[512,128], index: 0, kind: input, shape index: {}]   ;;  %s1976_s1 = inlined_call_operand.hbm [shape: bf16[128,128], index: 1, kind: input, shape index: {}]   ;;  %s1977_s2 = inlined_call_operand.vmem [shape: f32[1,128], index: 2, kind: input, shape index: {}]   ;;  %s1978_s3 = inlined_call_operand.vmem [shape: f32[1,128], index: 3, kind: input, shape index: {}]   ;;  %s1979_s4 = inlined_call_operand.hbm [shape: bf16[512,128], index: 4, kind: output, shape index: {}]  }
   0x1   :  { %11 = vsyncpa [#allocation3 + $0x1], 0 }
   0x2   :  { %12 = vsyncpa [#allocation6], 0 }
   0x3   :  { %13 = vsyncpa [#allocation4], 0 }
   0x4   :  { %15 = vsyncpa [#allocation4 + $0x1], 0  ;;  %s1635_s15 = smov 0   ;;  %s1637_s16 = smov 0  }
   0x5   :  { %s1639_s17 = smov 0   ;;  %s1641_s18 = smov 0  }
   0x6   :  { %s1643_s19 = smov 0   ;;  %s1645_s20 = smov 0  }
   0x7 LB: > { %s1062_s21 = sadd.s32 4294967295, %s1601_s20   ;;  %s1063_s22 = sadd.s32 4294967294, %s1601_s20   ;;  %s1601_s20 = sphi %s1645_s20, %s21_s20   ;;  %s1597_s19 = sphi %s1643_s19, %s2003_s19   ;;  %s1593_s18 = sphi %s1641_s18, %s2002_s18   ;;  %s1589_s17 = sphi %s1639_s17, %s2001_s17   ;;  %s1585_s16 = sphi %s1637_s16, %s2000_s16   ;;  %s1581_s15 = sphi %s1635_s15, %s1999_s15  }
   0x8   : > { %p62_p0 = scmp.ne.s32.totalorder %s1585_s16, %s1581_s15  ;;  %p1669_p1 = scmp.eq.s32.totalorder %s1062_s21, 0 }
   0x9   : > { %p1673_p2 = scmp.eq.s32.totalorder %s1062_s21, 1  ;;  %p174_p3 = scmp.eq.s32.totalorder %s1063_s22, 1 }
   0xa   : > { %s1984_s23 = scalar_select %p1669_p1, 1, 0 }
   0xb   : > { %s1985_s24 = scalar_select %p1673_p2, 1, 0 }
   0xc   : > { %p1679_p4 = por %p1669_p1, %p62_p0  ;;  %p1064_p5 = scmp.ge.s32.totalorder %s1601_s20, 1 }
   0xd   : > { %p1684_p6 = por %p174_p3, %p62_p0  ;;  %p181_p7 = scmp.lt.s32.totalorder %s1601_s20, 3 }
   0xe   : > { %s1986_s25 = scalar_select %p1679_p4, 1, 0 }
   0xf   : > { %s1987_s26 = scalar_select %p1684_p6, 1, 0 }
  0x10   : > { %p1689_p8 = pnand %p1064_p5, %p181_p7  ;;  %s1603_s28 = smov [#allocation5]  }
  0x11   : > { %s197_s29 = sshll.u32 %s1603_s28, 4  ;;  %s40_s5 = sadd.s32 1, %s1597_s19  ;;  %s198_s29 = int_to_ptr.vmem [resolvable:$true] %s197_s29 }
  0x12   : > { %s1988_s27 = scalar_select %p1689_p8, 1, 0 }
  0x13   : > { %p1364_p9 = pneg %p1689_p8  ;;  %s1457_s8 = scalar_lea.hbm %s1976_s1, 1024 }
  0x14   : > { %p1458_p12 = scmp.ne.s32.totalorder %s1976_s1, %s1457_s8  ;;  %p1464_p5 = scmp.lt.u32.totalorder %s1457_s8, %s1976_s1 }
  0x15   : > { %p1698_p11 = pnand %p1364_p9, %p1669_p1 }
  0x17   : > { %p1459_p13 = pneg %p1698_p11 }
  0x19   : > { %p1460_p0 = pnand %p1459_p13, %p1458_p12 }
  0x1b   : > { %p1461_p3 = pneg %p1460_p0 }
  0x1d   : > { %p1466_p7 = pnand %p1464_p5, %p1461_p3 }
  0x1f   : > { %1469 = shalt.err (!%p1466_p7)
}
  0x20   : > { %s1470_s13 = scalar_lea.vmem %s198_s29, 1024  ;;  %p1478_p1 = scmp.lt.s32.totalorder %s198_s29, %s198_s29 }
  0x21   : > { %p1471_p9 = scmp.ne.s32.totalorder %s198_s29, %s1470_s13  ;;  %p1479_p4 = scmp.lt.s32.totalorder %s1470_s13, %s1470_s13 }
  0x23   : > { %p1473_p10 = pnand %p1471_p9, %p1459_p13  ;;  %p1480_p8 = por %p1479_p4, %p1478_p1 }
  0x25   : > { %p1474_p6 = pneg %p1473_p10 }
  0x27   : > { %p1481_p2 = pnand %p1480_p8, %p1474_p6 }
  0x29   : > { %1484 = shalt.err (!%p1481_p2)
}
  0x2a   : > { %s1604_s14 = smov 64   ;;  %s1605_s21 = smov 4  }
  0x2b   : > { %1367 = dma.hbm_to_vmem [thread:$0]  (!%p1698_p11), %s1976_s1, 1024, %s198_s29, [#allocation6], %s1604_s14, %s1604_s14, %s1605_s21  }
  0x2c   : > { %p42_p1 = scmp.ge.s32.totalorder %s40_s5, 2  ;;  %s49_s6 = sadd.s32 1, %s1589_s17 }
  0x2d   : > { %p56_p2 = scmp.ne.s32.totalorder %s1589_s17, %s1585_s16  ;;  %p57_p4 = scmp.eq.s32.totalorder %s1601_s20, 0 }
  0x2e   : > { %s2005_s5 = smov (%p42_p1, %s40_s5), 0  ;;  %p1991_p8 = scmp.ne.s32.totalorder %s1985_s24, 0 }
  0x2f   : > { %p1728_p6 = por %p57_p4, %p56_p2  ;;  %s44_s8 = ssub.s32 %s1597_s19, %s2005_s5 }
  0x30   : > { %p1734_p10 = por %p1991_p8, %p56_p2  ;;  %p1377_p12 = scmp.lt.s32.totalorder %s1601_s20, 2 }
  0x31   : > { %p47_p11 = scmp.eq.s32.totalorder %s44_s8, 0  ;;  %s223_s29 = sand.u32 1, %s1589_s17  }
  0x32   : > { %s1069_s9 = sshll.u32 %s223_s29, 7  ;;  %s1139_s11 = sshll.u32 %s1597_s19, 11 }
  0x33   : > { %s1743_s10 = scalar_select %p47_p11, %s1589_s17, %s49_s6  }
  0x34   : > { %s1749_s22 = scalar_lea.hbm %s1975_s0, %s1139_s11  ;;  %s227_s24 = scalar_lea.vmem [#allocation2], %s1069_s9 }
  0x35   : > { %s235_s28 = sshll.u32 %s227_s24, 4  ;;  %p1755_p13 = pnand %p1377_p12, %p1728_p6  ;;  %s1751_s28 = int_to_ptr.vmem [resolvable:$true] %s235_s28 }
  0x36   : > { %s1759_s6 = scalar_lea.sflag [#allocation3], %s223_s29  ;;  %s1485_s12 = scalar_lea.hbm %s1749_s22, 2048 }
  0x37   : > { %p1486_p0 = scmp.ne.s32.totalorder %s1749_s22, %s1485_s12  ;;  %p1487_p3 = pneg %p1755_p13 }
  0x38   : > { %s1490_s7 = scalar_lea.hbm %s1975_s0, 4096  ;;  %p1491_p9 = scmp.lt.u32.totalorder %s1749_s22, %s1975_s0 }
  0x39   : > { %p1488_p5 = pnand %p1487_p3, %p1486_p0  ;;  %p1492_p1 = scmp.lt.u32.totalorder %s1490_s7, %s1485_s12 }
  0x3a   : > { %p1494_p4 = scmp.lt.u32.totalorder %s1485_s12, %s1749_s22 }
  0x3b   : > { %p1489_p7 = pneg %p1488_p5  ;;  %p1493_p2 = por %p1492_p1, %p1491_p9 }
  0x3d   : > { %p1495_p6 = por %p1494_p4, %p1493_p2 }
  0x3f   : > { %p1496_p8 = pnand %p1495_p6, %p1489_p7 }
  0x41   : > { %1499 = shalt.err (!%p1496_p8)
}
  0x42   : > { %s1500_s29 = scalar_lea.vmem %s1751_s28, 2048  ;;  %s1606_s9 = smov [#allocation2]  }
  0x43   : > { %p1501_p12 = scmp.ne.s32.totalorder %s1751_s28, %s1500_s29  ;;  %s1505_s11 = sshll.u32 %s1606_s9, 4  ;;  %s1506_s11 = int_to_ptr.vmem [resolvable:$false] %s1505_s11 }
  0x44   : > { %s1507_s13 = scalar_lea.vmem %s1506_s11, 4096  ;;  %p1508_p5 = scmp.lt.s32.totalorder %s1751_s28, %s1506_s11 }
  0x45   : > { %p1503_p11 = pnand %p1501_p12, %p1487_p3  ;;  %p1509_p9 = scmp.lt.s32.totalorder %s1507_s13, %s1500_s29 }
  0x47   : > { %p1504_p0 = pneg %p1503_p11  ;;  %p1510_p1 = por %p1509_p9, %p1508_p5 }
  0x49   : > { %p1511_p2 = pnand %p1510_p1, %p1504_p0 }
  0x4b   : > { %1514 = shalt.err (!%p1511_p2)
}
  0x4c   : > { %1371 = dma.hbm_to_vmem [thread:$0]  (!%p1755_p13), %s1749_s22, 2048, %s1751_s28, %s1759_s6, %s1604_s14, %s1604_s14, %s1605_s21  }
  0x4d   : > { %p1994_p3 = scmp.ne.s32.totalorder %s1988_s27, 0 }
  0x4e   : > { %s1793_s12 = sand.u32 (!%p1994_p3), 1, %s1585_s16   ;;  %p1995_p7 = scmp.ne.s32.totalorder (!%p1994_p3), %s1986_s25, 0 }
  0x4f   : > { %247 = sbr.rel (%p1994_p3) target bundleno = 386 (0x182), region = 36  ;;  %s1073_s7 = sshll.u32 (!%p1994_p3), %s1793_s12, 7 }
  0x50   : > { %s250_s24 = scalar_lea.sflag (!%p1994_p3), [#allocation3], %s1793_s12  ;;  %s1799_s8 = scalar_lea.vmem (!%p1994_p3), [#allocation2], %s1073_s7 }
  0x56   : > { %1568 = dma.done.wait (%p1995_p7), %s250_s24, 2048  }
  0x57   : > { %1570 = vsyncadd (%p1995_p7), %s250_s24, 4294965248  ;;  %p1996_p13 = scmp.ne.s32.totalorder %s1984_s23, 0 }
  0x59   : > { %1572 = dma.done.wait (%p1996_p13), [#allocation6], 1024  }
  0x5a   : > { %1574 = vsyncadd (%p1996_p13), [#allocation6], 4294966272  ;;  %v1433_v0 = vld [vmem:[#allocation5] sm:$0xff]   ;;  %v1434_v1 = vld [vmem:[#allocation5 + $0x8] sm:$0xff]   ;;  %s1857_s21 = scalar_lea.vmem [#allocation7], %s1073_s7  ;;  %s1172_s22 = sshll.u32 %s1593_s18, 11 }
  0x5b   : > { %1292 = vmatprep.subr.bf16.mxu0 %v1433_v0  ;;  %1340 = vmatprep.subr.bf16.mxu1 %v1433_v0  ;;  %v1435_v2 = vld [vmem:[#allocation5 + $0x10] sm:$0xff]   ;;  %v1436_v3 = vld [vmem:[#allocation5 + $0x18] sm:$0xff]   ;;  %v1441_v4 = vld [vmem:[%s1799_s8] sm:$0xff]   ;;  %s936_s28 = sshll.u32 %s1857_s21, 4  ;;  %s1920_s18 = scalar_lea.hbm %s1979_s4, %s1172_s22  ;;  %s1922_s28 = int_to_ptr.vmem [resolvable:$true] %s936_s28 }
  0x5c   : > { %1293 = vmatpush3.bf16.msra.mxu0 %v1433_v0  ;;  %1348 = vmatpush3.bf16.msra.mxu1 %v1433_v0  ;;  %v1442_v5 = vld [vmem:[%s1799_s8 + $0x40] sm:$0xff]   ;;  %v1438_v7 = vld [vmem:[#allocation5 + $0x28] sm:$0xff]   ;;  %v1439_v8 = vld [vmem:[#allocation5 + $0x30] sm:$0xff]   ;;  %s922_s9 = scalar_lea.sflag [#allocation4], %s1793_s12  ;;  %s1515_s11 = scalar_lea.vmem %s1922_s28, 2048 }
  0x5d   : > { %1294 = vmatprep.subr.bf16.mxu0 %v1434_v1  ;;  %1341 = vmatprep.subr.bf16.mxu1 %v1434_v1  ;;  %v1437_v6 = vld [vmem:[#allocation5 + $0x20] sm:$0xff]   ;;  %v1440_v9 = vld [vmem:[#allocation5 + $0x38] sm:$0xff]   ;;  %v1443_v10 = vld [vmem:[%s1799_s8 + $0x8] sm:$0xff]   ;;  %p1516_p4 = scmp.ne.s32.totalorder %s1922_s28, %s1515_s11  ;;  %s1607_s13 = smov [#allocation7]  }
  0x5e   : > { %1308 = vmatprep.mubr.bf16.mxu0 %v1441_v4  ;;  %1324 = vmatprep.mubr.bf16.mxu1 %v1442_v5  ;;  %v1444_v11 = vld [vmem:[%s1799_s8 + $0x48] sm:$0xff]   ;;  %v1445_v12 = vld [vmem:[%s1799_s8 + $0x10] sm:$0xff]   ;;  %v1447_v14 = vld [vmem:[%s1799_s8 + $0x18] sm:$0xff]   ;;  %s1519_s7 = sshll.u32 %s1607_s13, 4  ;;  %s1520_s7 = int_to_ptr.vmem [resolvable:$false] %s1519_s7 }
  0x5f   : > { %v1446_v13 = vld [vmem:[%s1799_s8 + $0x50] sm:$0xff]   ;;  %v1448_v15 = vld [vmem:[%s1799_s8 + $0x58] sm:$0xff]   ;;  %v1449_v16 = vld [vmem:[%s1799_s8 + $0x20] sm:$0xff]   ;;  %p1517_p6 = pnand %p1516_p4, %p1734_p10  ;;  %s1521_s24 = scalar_lea.vmem %s1520_s7, 4096 }
  0x60   : > { %1295 = vmatpush3.bf16.msra.mxu0 %v1434_v1  ;;  %1349 = vmatpush3.bf16.msra.mxu1 %v1434_v1  ;;  %v1450_v17 = vld [vmem:[%s1799_s8 + $0x60] sm:$0xff]   ;;  %v1451_v18 = vld [vmem:[%s1799_s8 + $0x28] sm:$0xff]   ;;  %v1453_v20 = vld [vmem:[%s1799_s8 + $0x30] sm:$0xff]   ;;  %p1522_p12 = scmp.lt.s32.totalorder %s1922_s28, %s1520_s7  ;;  %p1523_p11 = scmp.lt.s32.totalorder %s1521_s24, %s1515_s11 }
  0x61   : > { %1296 = vmatprep.subr.bf16.mxu0 %v1435_v2  ;;  %1342 = vmatprep.subr.bf16.mxu1 %v1435_v2  ;;  %v1452_v19 = vld [vmem:[%s1799_s8 + $0x68] sm:$0xff]   ;;  %v1454_v21 = vld [vmem:[%s1799_s8 + $0x70] sm:$0xff]   ;;  %v1455_v22 = vld [vmem:[%s1799_s8 + $0x38] sm:$0xff]   ;;  %p1518_p8 = pneg %p1517_p6 }
  0x62   : > { %v1456_v23 = vld [vmem:[%s1799_s8 + $0x78] sm:$0xff]   ;;  %v1828_v24 = vld [vmem:[%s1977_s2] ss:$0 sm:$0xff]  ;;  %p1524_p0 = por %p1523_p11, %p1522_p12 }
  0x63   : > { %v1833_v26 = vld [vmem:[%s1978_s3] ss:$0 sm:$0xff] }
  0x64   : > { %1297 = vmatpush3.bf16.msra.mxu0 %v1435_v2  ;;  %1350 = vmatpush3.bf16.msra.mxu1 %v1435_v2  ;;  %p1525_p5 = pnand %p1524_p0, %p1518_p8 }
  0x65   : > { %1298 = vmatprep.subr.bf16.mxu0 %v1436_v3  ;;  %1343 = vmatprep.subr.bf16.mxu1 %v1436_v3 }
  0x68   : > { %1299 = vmatpush3.bf16.msra.mxu0 %v1436_v3  ;;  %1351 = vmatpush3.bf16.msra.mxu1 %v1436_v3 }
  0x69   : > { %1300 = vmatprep.subr.bf16.mxu0 %v1437_v6  ;;  %1344 = vmatprep.subr.bf16.mxu1 %v1437_v6 }
  0x6c   : > { %1301 = vmatpush3.bf16.msra.mxu0 %v1437_v6  ;;  %1352 = vmatpush3.bf16.msra.mxu1 %v1437_v6 }
  0x6d   : > { %1302 = vmatprep.subr.bf16.mxu0 %v1438_v7  ;;  %1345 = vmatprep.subr.bf16.mxu1 %v1438_v7 }
  0x70   : > { %1303 = vmatpush3.bf16.msra.mxu0 %v1438_v7  ;;  %1353 = vmatpush3.bf16.msra.mxu1 %v1438_v7 }
  0x71   : > { %1304 = vmatprep.subr.bf16.mxu0 %v1439_v8  ;;  %1346 = vmatprep.subr.bf16.mxu1 %v1439_v8 }
  0x74   : > { %1305 = vmatpush3.bf16.msra.mxu0 %v1439_v8  ;;  %1354 = vmatpush3.bf16.msra.mxu1 %v1439_v8 }
  0x75   : > { %1306 = vmatprep.subr.bf16.mxu0 %v1440_v9  ;;  %1347 = vmatprep.subr.bf16.mxu1 %v1440_v9 }
  0x78   : > { %1307 = vmatpush3.bf16.msra.mxu0 %v1440_v9  ;;  %1355 = vmatpush3.bf16.msra.mxu1 %v1440_v9 }
  0x7b   : > { %1309 = vmatmul.mubr.bf16.vlgmr.msra.gmra.mrb[0].mxu0 %v1443_v10  ;;  %1325 = vmatmul.mubr.bf16.vlgmr.msra.gmra.mrb[0].mxu1 %v1444_v11 }
  0x7c   : > { %1312 = vmatprep.mubr.bf16.mxu0 %v1445_v12  ;;  %1328 = vmatprep.mubr.bf16.mxu1 %v1446_v13 }
  0x83   : > { %1313 = vmatmul.mubr.bf16.gmra.mrb[4].mxu0 %v1447_v14  ;;  %1329 = vmatmul.mubr.bf16.gmra.mrb[4].mxu1 %v1448_v15 }
  0x84   : > { %1316 = vmatprep.mubr.bf16.mxu0 %v1449_v16  ;;  %1332 = vmatprep.mubr.bf16.mxu1 %v1450_v17 }
  0x8b   : > { %1317 = vmatmul.mubr.bf16.gmra.mrb[8].mxu0 %v1451_v18  ;;  %1333 = vmatmul.mubr.bf16.gmra.mrb[8].mxu1 %v1452_v19 }
  0x8c   : > { %1320 = vmatprep.mubr.bf16.mxu0 %v1453_v20  ;;  %1336 = vmatprep.mubr.bf16.mxu1 %v1454_v21 }
  0x93   : > { %1321 = vmatmul.mubr.bf16.gmra.mrb[12].mxu0 %v1455_v22  ;;  %1337 = vmatmul.mubr.bf16.gmra.mrb[12].mxu1 %v1456_v23 }
 0x14e   : > { %v1310_v25 = vpop.f32.mrb[0].mxu0  ;;  %v1326_v27 = vpop.f32.mrb[0].mxu1 }
 0x14f   : > { %v660_v28 = vmul.f32 %v1310_v25, %v1828_v24  ;;  %v676_v29 = vmul.f32 %v1326_v27, %v1828_v24  ;;  %v524_v30 = vpop.f32.mrb[1].mxu0  ;;  %v588_v31 = vpop.f32.mrb[1].mxu1 }
 0x150   : > { %v658_v32 = vmul.f32 %v1828_v24, %v524_v30  ;;  %v674_v33 = vmul.f32 %v1828_v24, %v588_v31  ;;  %v1311_v34 = vpop.f32.mrb[2].mxu0  ;;  %v1327_v35 = vpop.f32.mrb[2].mxu1 }
 0x151   : > { %v699_v36 = vadd.f32 %v1833_v26, %v660_v28  ;;  %v715_v37 = vadd.f32 %v1833_v26, %v676_v29  ;;  %v661_v38 = vmul.f32 %v1311_v34, %v1828_v24  ;;  %v677_v39 = vmul.f32 %v1327_v35, %v1828_v24  ;;  %v527_v40 = vpop.f32.mrb[3].mxu0  ;;  %v591_v41 = vpop.f32.mrb[3].mxu1 }
 0x152   : > { %v697_v42 = vadd.f32 %v1833_v26, %v658_v32  ;;  %v713_v43 = vadd.f32 %v1833_v26, %v674_v33  ;;  %v659_v44 = vmul.f32 %v1828_v24, %v527_v40  ;;  %v675_v45 = vmul.f32 %v1828_v24, %v591_v41 }
 0x153   : > { %v700_v46 = vadd.f32 %v1833_v26, %v661_v38  ;;  %v716_v47 = vadd.f32 %v1833_v26, %v677_v39  ;;  %v731_v50 = vmax.f32 %v699_v36, 0.0  ;;  %v747_v51 = vmax.f32 %v715_v37, 0.0 }
 0x154   : > { %v698_v48 = vadd.f32 %v1833_v26, %v659_v44  ;;  %v714_v49 = vadd.f32 %v1833_v26, %v675_v45  ;;  %v729_v54 = vmax.f32 %v697_v42, 0.0  ;;  %v745_v55 = vmax.f32 %v713_v43, 0.0 }
 0x155   : > { %v732_v52 = vmax.f32 %v700_v46, 0.0  ;;  %v748_v53 = vmax.f32 %v716_v47, 0.0 }
 0x156   : > { %v730_v56 = vmax.f32 %v698_v48, 0.0  ;;  %v746_v57 = vmax.f32 %v714_v49, 0.0  ;;  %v1314_v58 = vpop.f32.mrb[4].mxu0  ;;  %v1330_v59 = vpop.f32.mrb[4].mxu1 }
 0x157   : > { %v1181_v60 = vpack.c.bf16 %v732_v52, %v731_v50  ;;  %v1221_v61 = vpack.c.bf16 %v748_v53, %v747_v51  ;;  %v664_v62 = vmul.f32 %v1314_v58, %v1828_v24  ;;  %v680_v63 = vmul.f32 %v1330_v59, %v1828_v24  ;;  %v540_v0 = vpop.f32.mrb[5].mxu0  ;;  %v604_v1 = vpop.f32.mrb[5].mxu1 }
 0x158   : > { %v1176_v2 = vpack.c.bf16 %v730_v56, %v729_v54  ;;  %v1216_v3 = vpack.c.bf16 %v746_v57, %v745_v55  ;;  %v662_v4 = vmul.f32 %v1828_v24, %v540_v0  ;;  %v678_v5 = vmul.f32 %v1828_v24, %v604_v1  ;;  %v1315_v6 = vpop.f32.mrb[6].mxu0  ;;  %v1331_v7 = vpop.f32.mrb[6].mxu1 }
 0x159   : > { %1253 = vst [vmem:[%s1857_s21 + $0x8] sm:$0xff] %v1181_v60   ;;  %1261 = vst [vmem:[%s1857_s21 + $0x48] sm:$0xff] %v1221_v61   ;;  %v703_v8 = vadd.f32 %v1833_v26, %v664_v62  ;;  %v719_v9 = vadd.f32 %v1833_v26, %v680_v63  ;;  %v665_v10 = vmul.f32 %v1315_v6, %v1828_v24  ;;  %v543_v12 = vpop.f32.mrb[7].mxu0  ;;  %v607_v13 = vpop.f32.mrb[7].mxu1 }
 0x15a   : > { %v681_v11 = vmul.f32 %v1331_v7, %v1828_v24  ;;  %1177 = vst [vmem:[%s1857_s21] sm:$0xff] %v1176_v2   ;;  %1260 = vst [vmem:[%s1857_s21 + $0x40] sm:$0xff] %v1216_v3   ;;  %v701_v14 = vadd.f32 %v1833_v26, %v662_v4  ;;  %v717_v15 = vadd.f32 %v1833_v26, %v678_v5 }
 0x15b   : > { %v663_v16 = vmul.f32 %v1828_v24, %v543_v12  ;;  %v679_v17 = vmul.f32 %v1828_v24, %v607_v13  ;;  %v704_v18 = vadd.f32 %v1833_v26, %v665_v10  ;;  %v735_v22 = vmax.f32 %v703_v8, 0.0 }
 0x15c   : > { %v720_v19 = vadd.f32 %v1833_v26, %v681_v11  ;;  %v751_v23 = vmax.f32 %v719_v9, 0.0  ;;  %v733_v28 = vmax.f32 %v701_v14, 0.0  ;;  %v749_v29 = vmax.f32 %v717_v15, 0.0 }
 0x15d   : > { %v702_v20 = vadd.f32 %v1833_v26, %v663_v16  ;;  %v718_v21 = vadd.f32 %v1833_v26, %v679_v17  ;;  %v736_v25 = vmax.f32 %v704_v18, 0.0 }
 0x15e   : > { %v752_v27 = vmax.f32 %v720_v19, 0.0  ;;  %v1318_v32 = vpop.f32.mrb[8].mxu0  ;;  %v1334_v33 = vpop.f32.mrb[8].mxu1 }
 0x15f   : > { %v734_v30 = vmax.f32 %v702_v20, 0.0  ;;  %v750_v31 = vmax.f32 %v718_v21, 0.0  ;;  %v1191_v34 = vpack.c.bf16 %v736_v25, %v735_v22  ;;  %v668_v36 = vmul.f32 %v1318_v32, %v1828_v24  ;;  %v556_v38 = vpop.f32.mrb[9].mxu0  ;;  %v620_v39 = vpop.f32.mrb[9].mxu1 }
 0x160   : > { %v1231_v35 = vpack.c.bf16 %v752_v27, %v751_v23  ;;  %v684_v37 = vmul.f32 %v1334_v33, %v1828_v24  ;;  %v666_v42 = vmul.f32 %v1828_v24, %v556_v38  ;;  %v682_v43 = vmul.f32 %v1828_v24, %v620_v39  ;;  %v1319_v44 = vpop.f32.mrb[10].mxu0  ;;  %v1335_v45 = vpop.f32.mrb[10].mxu1 }
 0x161   : > { %v1186_v40 = vpack.c.bf16 %v734_v30, %v733_v28  ;;  %v1226_v41 = vpack.c.bf16 %v750_v31, %v749_v29  ;;  %1255 = vst [vmem:[%s1857_s21 + $0x18] sm:$0xff] %v1191_v34   ;;  %v707_v46 = vadd.f32 %v1833_v26, %v668_v36  ;;  %v669_v48 = vmul.f32 %v1319_v44, %v1828_v24  ;;  %v559_v50 = vpop.f32.mrb[11].mxu0  ;;  %v623_v51 = vpop.f32.mrb[11].mxu1 }
 0x162   : > { %1263 = vst [vmem:[%s1857_s21 + $0x58] sm:$0xff] %v1231_v35   ;;  %v723_v47 = vadd.f32 %v1833_v26, %v684_v37  ;;  %v685_v49 = vmul.f32 %v1335_v45, %v1828_v24  ;;  %v705_v52 = vadd.f32 %v1833_v26, %v666_v42  ;;  %v721_v53 = vadd.f32 %v1833_v26, %v682_v43 }
 0x163   : > { %1254 = vst [vmem:[%s1857_s21 + $0x10] sm:$0xff] %v1186_v40   ;;  %1262 = vst [vmem:[%s1857_s21 + $0x50] sm:$0xff] %v1226_v41   ;;  %v667_v54 = vmul.f32 %v1828_v24, %v559_v50  ;;  %v683_v55 = vmul.f32 %v1828_v24, %v623_v51  ;;  %v708_v56 = vadd.f32 %v1833_v26, %v669_v48  ;;  %v739_v60 = vmax.f32 %v707_v46, 0.0 }
 0x164   : > { %v724_v57 = vadd.f32 %v1833_v26, %v685_v49  ;;  %v755_v61 = vmax.f32 %v723_v47, 0.0  ;;  %v737_v0 = vmax.f32 %v705_v52, 0.0  ;;  %v753_v1 = vmax.f32 %v721_v53, 0.0 }
 0x165   : > { %v706_v58 = vadd.f32 %v1833_v26, %v667_v54  ;;  %v722_v59 = vadd.f32 %v1833_v26, %v683_v55  ;;  %v740_v62 = vmax.f32 %v708_v56, 0.0 }
 0x166   : > { %v756_v63 = vmax.f32 %v724_v57, 0.0  ;;  %v1322_v4 = vpop.f32.mrb[12].mxu0  ;;  %v1338_v5 = vpop.f32.mrb[12].mxu1 }
 0x167   : > { %v738_v2 = vmax.f32 %v706_v58, 0.0  ;;  %v754_v3 = vmax.f32 %v722_v59, 0.0  ;;  %v1201_v6 = vpack.c.bf16 %v740_v62, %v739_v60  ;;  %v672_v8 = vmul.f32 %v1322_v4, %v1828_v24  ;;  %v572_v10 = vpop.f32.mrb[13].mxu0  ;;  %v636_v11 = vpop.f32.mrb[13].mxu1 }
 0x168   : > { %v1241_v7 = vpack.c.bf16 %v756_v63, %v755_v61  ;;  %v688_v9 = vmul.f32 %v1338_v5, %v1828_v24  ;;  %v670_v14 = vmul.f32 %v1828_v24, %v572_v10  ;;  %v686_v15 = vmul.f32 %v1828_v24, %v636_v11  ;;  %v1323_v16 = vpop.f32.mrb[14].mxu0  ;;  %v1339_v17 = vpop.f32.mrb[14].mxu1 }
 0x169   : > { %v1196_v12 = vpack.c.bf16 %v738_v2, %v737_v0  ;;  %v1236_v13 = vpack.c.bf16 %v754_v3, %v753_v1  ;;  %1257 = vst [vmem:[%s1857_s21 + $0x28] sm:$0xff] %v1201_v6   ;;  %v711_v18 = vadd.f32 %v1833_v26, %v672_v8  ;;  %v673_v20 = vmul.f32 %v1323_v16, %v1828_v24  ;;  %v575_v22 = vpop.f32.mrb[15].mxu0  ;;  %v639_v23 = vpop.f32.mrb[15].mxu1 }
 0x16a   : > { %1265 = vst [vmem:[%s1857_s21 + $0x68] sm:$0xff] %v1241_v7   ;;  %v727_v19 = vadd.f32 %v1833_v26, %v688_v9  ;;  %v689_v21 = vmul.f32 %v1339_v17, %v1828_v24  ;;  %v709_v25 = vadd.f32 %v1833_v26, %v670_v14  ;;  %v725_v27 = vadd.f32 %v1833_v26, %v686_v15 }
 0x16b   : > { %1256 = vst [vmem:[%s1857_s21 + $0x20] sm:$0xff] %v1196_v12   ;;  %1264 = vst [vmem:[%s1857_s21 + $0x60] sm:$0xff] %v1236_v13   ;;  %v671_v28 = vmul.f32 %v1828_v24, %v575_v22  ;;  %v687_v29 = vmul.f32 %v1828_v24, %v639_v23  ;;  %v712_v30 = vadd.f32 %v1833_v26, %v673_v20  ;;  %v743_v34 = vmax.f32 %v711_v18, 0.0 }
 0x16c   : > { %v728_v31 = vadd.f32 %v1833_v26, %v689_v21  ;;  %v759_v35 = vmax.f32 %v727_v19, 0.0  ;;  %v741_v24 = vmax.f32 %v709_v25, 0.0  ;;  %v757_v38 = vmax.f32 %v725_v27, 0.0 }
 0x16d   : > { %v710_v32 = vadd.f32 %v1833_v26, %v671_v28  ;;  %v726_v33 = vadd.f32 %v1833_v26, %v687_v29  ;;  %v744_v36 = vmax.f32 %v712_v30, 0.0 }
 0x16e   : > { %v760_v37 = vmax.f32 %v728_v31, 0.0 }
 0x16f   : > { %v742_v39 = vmax.f32 %v710_v32, 0.0  ;;  %v758_v40 = vmax.f32 %v726_v33, 0.0  ;;  %v1211_v41 = vpack.c.bf16 %v744_v36, %v743_v34 }
 0x170   : > { %v1251_v42 = vpack.c.bf16 %v760_v37, %v759_v35 }
 0x171   : > { %v1206_v26 = vpack.c.bf16 %v742_v39, %v741_v24  ;;  %v1246_v43 = vpack.c.bf16 %v758_v40, %v757_v38  ;;  %1259 = vst [vmem:[%s1857_s21 + $0x38] sm:$0xff] %v1211_v41  }
 0x172   : > { %1267 = vst [vmem:[%s1857_s21 + $0x78] sm:$0xff] %v1251_v42  }
 0x173   : > { %1258 = vst [vmem:[%s1857_s21 + $0x30] sm:$0xff] %v1206_v26   ;;  %1266 = vst [vmem:[%s1857_s21 + $0x70] sm:$0xff] %v1246_v43  }
 0x174   : > { %1528 = shalt.err (!%p1525_p5)
}
 0x175   : > { %s1529_s8 = scalar_lea.hbm %s1920_s18, 2048  ;;  %s1533_s27 = scalar_lea.hbm %s1979_s4, 4096 }
 0x176   : > { %p1530_p9 = scmp.ne.s32.totalorder %s1920_s18, %s1529_s8  ;;  %p1534_p3 = scmp.lt.u32.totalorder %s1920_s18, %s1979_s4 }
 0x177   : > { %p1535_p7 = scmp.lt.u32.totalorder %s1533_s27, %s1529_s8  ;;  %p1537_p4 = scmp.lt.u32.totalorder %s1529_s8, %s1920_s18 }
 0x178   : > { %p1531_p1 = pnand %p1530_p9, %p1734_p10 }
 0x179   : > { %p1536_p13 = por %p1535_p7, %p1534_p3 }
 0x17a   : > { %p1532_p2 = pneg %p1531_p1 }
 0x17b   : > { %p1538_p6 = por %p1537_p4, %p1536_p13 }
 0x17d   : > { %p1539_p8 = pnand %p1538_p6, %p1532_p2 }
 0x17f   : > { %1542 = shalt.err (!%p1539_p8)
}
 0x180   : > { %s1608_s22 = smov 64   ;;  %s1609_s6 = smov 4  }
 0x181   : > { %1362 = dma.vmem_to_hbm [thread:$0]  (%p1734_p10), %s1922_s28, 2048, %s1920_s18, %s922_s9, %s1608_s22, %s1608_s22, %s1609_s6  }
 0x182 PF: > { %s951_s29 = sand.u32 1, %s1581_s15   ;;  %p1997_p12 = scmp.ne.s32.totalorder %s1987_s26, 0 }
 0x183   : > { %p1998_p11 = scmp.ge.s32.totalorder %s1601_s20, 2  ;;  %s952_s11 = scalar_lea.sflag [#allocation4], %s951_s29 }
 0x185   : > { %p1373_p0 = pnand %p1998_p11, %p1997_p12 }
 0x187   : > { %1576 = dma.done.wait (!%p1373_p0), %s952_s11, 2048  }
 0x188   : > { %1578 = vsyncadd (!%p1373_p0), %s952_s11, 4294965248  ;;  %s21_s20 = sadd.s32 1, %s1601_s20   ;;  %s1999_s15 = smov %s1585_s16 }
 0x189   : > { %p18_p5 = scmp.ge.s32.totalorder %s21_s20, 4   ;;  %s2000_s16 = smov %s1589_s17 }
 0x18a   : > { %s2001_s17 = smov %s1743_s10  ;;  %s2002_s18 = smov %s1597_s19 }
 0x18b   : > { %s2003_s19 = smov %s2005_s5  ;;  %20 = sbr.rel (!%p18_p5) target bundleno = 7 (0x7), region = 92 }
 0x192   :  { %957 = vsyncpa [#allocation3], 1 }
 0x193   :  { %959 = vsyncpa [#allocation3 + $0x1], 1 }
 0x194   :  { %960 = vsyncpa [#allocation6], 1 }
 0x195   :  { %961 = vsyncpa [#allocation4], 1 }
 0x196   :  { %963 = vsyncpa [#allocation4 + $0x1], 1 }

</bundles_post_ra>
